<compile_context>
chip_gen: v7x
topology: tpu7x:2x2x1
jax: 0.10.0
libtpu: 0.0.40
codegen_flags: <defaults>
</compile_context>

<pallas_src>
import functools

import jax
import jax.numpy as jnp
from jax.experimental import pallas as pl
from jax.experimental.pallas import tpu as pltpu


def _round_up(x, m):
    return (x + m - 1) // m * m


# ----------------------- fused conv matmul (Pallas) -----------------------

def _make_fused_matmul_kernel(in_bn, out_bn, out_relu):
    """out = epilogue(prologue(A) @ B); bf16 MXU inputs, f32 accumulation."""

    def kernel(*refs):
        idx = 0
        a_ref, b_ref = refs[idx], refs[idx + 1]
        idx += 2
        if in_bn:
            isc_ref, ish_ref = refs[idx], refs[idx + 1]
            idx += 2
        if out_bn:
            osc_ref, osh_ref = refs[idx], refs[idx + 1]
            idx += 2
        o_ref, acc_ref = refs[idx], refs[idx + 1]

        @pl.when(pl.program_id(2) == 0)
        def _():
            acc_ref[...] = jnp.zeros_like(acc_ref)

        a = a_ref[...]
        if in_bn:
            a = a.astype(jnp.float32) * isc_ref[...] + ish_ref[...]
            a = jnp.maximum(a, 0.0)
        a = a.astype(b_ref.dtype)
        acc_ref[...] += jnp.dot(a, b_ref[...],
                                preferred_element_type=jnp.float32)

        @pl.when(pl.program_id(2) == pl.num_programs(2) - 1)
        def _():
            y = acc_ref[...]
            if out_bn:
                y = y * osc_ref[...] + osh_ref[...]
            if out_relu:
                y = jnp.maximum(y, 0.0)
            o_ref[...] = y.astype(o_ref.dtype)

    return kernel


def _matmul_tiles(M, K, N):
    pK = _round_up(K, 128)
    if pK <= 2048:
        tk = pK                        # single k step for every layer here
    else:
        tk = 512
        pK = _round_up(K, tk)
    if M >= 256:
        tm, pM = 256, _round_up(M, 256)
    elif M >= 128:
        tm, pM = 128, _round_up(M, 128)
    else:
        pM = _round_up(M, 8)
        tm = pM
    pN = _round_up(N, 128)
    # 256-wide output tiles match the v6e/v7x MXU; keep 128 tiles when M is
    # small so the i/j grid keeps >=1 extra step (and for narrow outputs).
    tn = 256 if (tm >= 128 and pN % 256 == 0) else 128
    return pM, pK, pN, tm, tk, tn


@functools.partial(jax.jit, static_argnames=("out_relu", "out_dtype"))
def fused_matmul(a, b, in_scale=None, in_shift=None, out_scale=None,
                 out_shift=None, *, out_relu=False, out_dtype=jnp.bfloat16):
    M, K = a.shape
    K2, N = b.shape
    assert K == K2
    in_bn = in_scale is not None
    out_bn = out_scale is not None
    pM, pK, pN, tm, tk, tn = _matmul_tiles(M, K, N)

    a_p = a if a.dtype == jnp.bfloat16 else a.astype(jnp.bfloat16)
    if (pM, pK) != (M, K):
        a_p = jnp.pad(a_p, ((0, pM - M), (0, pK - K)))
    b_p = b if b.dtype == jnp.bfloat16 else b.astype(jnp.bfloat16)
    if (pK, pN) != (K, N):
        b_p = jnp.pad(b_p, ((0, pK - K), (0, pN - N)))

    operands = [a_p, b_p]
    in_specs = [pl.BlockSpec((tm, tk), lambda i, j, k: (i, k)),
                pl.BlockSpec((tk, tn), lambda i, j, k: (k, j))]
    if in_bn:
        isc = jnp.pad(in_scale.astype(jnp.float32), (0, pK - K)).reshape(1, pK)
        ish = jnp.pad(in_shift.astype(jnp.float32), (0, pK - K)).reshape(1, pK)
        operands += [isc, ish]
        in_specs += [pl.BlockSpec((1, tk), lambda i, j, k: (0, k)),
                     pl.BlockSpec((1, tk), lambda i, j, k: (0, k))]
    if out_bn:
        osc = jnp.pad(out_scale.astype(jnp.float32), (0, pN - N)).reshape(1, pN)
        osh = jnp.pad(out_shift.astype(jnp.float32), (0, pN - N)).reshape(1, pN)
        operands += [osc, osh]
        in_specs += [pl.BlockSpec((1, tn), lambda i, j, k: (0, j)),
                     pl.BlockSpec((1, tn), lambda i, j, k: (0, j))]

    out = pl.pallas_call(
        _make_fused_matmul_kernel(in_bn, out_bn, out_relu),
        out_shape=jax.ShapeDtypeStruct((pM, pN), out_dtype),
        grid_spec=pltpu.PrefetchScalarGridSpec(
            num_scalar_prefetch=0,
            grid=(pM // tm, pN // tn, pK // tk),
            in_specs=in_specs,
            out_specs=pl.BlockSpec((tm, tn), lambda i, j, k: (i, j)),
            scratch_shapes=[pltpu.VMEM((tm, tn), jnp.float32)],
        ),
        compiler_params=pltpu.CompilerParams(
            dimension_semantics=("parallel", "parallel", "arbitrary")),
    )(*operands)
    if (pM, pN) != (M, N):
        out = out[:M, :N]
    return out


# --------------------------- pooling kernels ------------------------------

def _pool_reduce_kernel(x_ref, o_ref, *, op):
    x = x_ref[...]                                   # (TM, k*k, C)
    if op == "max":
        o_ref[...] = jnp.max(x, axis=1).astype(o_ref.dtype)
    else:
        o_ref[...] = jnp.mean(x.astype(jnp.float32), axis=1).astype(o_ref.dtype)


@functools.partial(jax.jit, static_argnames=("op",))
def pool_reduce(p, op):
    """p: (M, k*k, C) -> (M, C); max/mean over axis 1, M tiled via the grid."""
    M, KK, C = p.shape
    if M >= 256:
        TM = 256
        pM = _round_up(M, TM)
    else:
        pM = _round_up(M, 8)
        TM = pM
    if pM != M:
        p = jnp.pad(p, ((0, pM - M), (0, 0), (0, 0)))
    out = pl.pallas_call(
        functools.partial(_pool_reduce_kernel, op=op),
        out_shape=jax.ShapeDtypeStruct((pM, C), p.dtype),
        grid=(pM // TM,),
        in_specs=[pl.BlockSpec((TM, KK, C), lambda i: (i, 0, 0))],
        out_specs=pl.BlockSpec((TM, C), lambda i: (i, 0)),
        compiler_params=pltpu.CompilerParams(
            dimension_semantics=("parallel",)),
    )(p)
    return out[:M] if pM != M else out


def _gap_bn_relu_kernel(x_ref, scale_ref, shift_ref, o_ref):
    x = x_ref[...].astype(jnp.float32)               # (N, HW, C)
    s = scale_ref[...].reshape(1, 1, -1)
    t = shift_ref[...].reshape(1, 1, -1)
    x = jnp.maximum(x * s + t, 0.0)
    o_ref[...] = jnp.mean(x, axis=1)                 # (N, C) f32


def _bn_fold(bn, eps=1e-5):
    scale = bn["gamma"] / jnp.sqrt(bn["var"] + eps)
    shift = bn["beta"] - bn["mean"] * scale
    return scale, shift


@jax.jit
def global_avgpool_bn_relu(x, bn):
    """relu(norm5(x)) followed by global average pooling, fused."""
    N, H, W, C = x.shape
    scale, shift = _bn_fold(bn)
    xr = x.reshape(N, H * W, C)
    sc = scale.astype(jnp.float32).reshape(1, C)
    sh = shift.astype(jnp.float32).reshape(1, C)
    return pl.pallas_call(
        _gap_bn_relu_kernel,
        out_shape=jax.ShapeDtypeStruct((N, C), jnp.float32),
        grid=(1,),
        in_specs=[pl.BlockSpec((N, H * W, C), lambda i: (0, 0, 0)),
                  pl.BlockSpec((1, C), lambda i: (0, 0)),
                  pl.BlockSpec((1, C), lambda i: (0, 0))],
        out_specs=pl.BlockSpec((N, C), lambda i: (0, 0)),
    )(xr, sc, sh)


# ----------------------- classifier (linear + sigmoid) --------------------

def _linear_sigmoid_kernel(x_ref, w_ref, b_ref, o_ref):
    y = jnp.dot(x_ref[...], w_ref[...], preferred_element_type=jnp.float32)
    y = y + b_ref[...]
    p = pl.reciprocal(1.0 + jnp.exp(-y), approx=True)   # divide on EUP
    o_ref[...] = jnp.minimum(p, 1.0)


@jax.jit
def linear_sigmoid(x, w, b):
    M, K = x.shape
    _, N = w.shape
    pM = _round_up(M, 8)
    pK = _round_up(K, 128)
    pN = _round_up(N, 128)
    xp = jnp.pad(x.astype(jnp.float32), ((0, pM - M), (0, pK - K)))
    wp = jnp.pad(w.astype(jnp.float32), ((0, pK - K), (0, pN - N)))
    bp = jnp.pad(b.astype(jnp.float32), (0, pN - N)).reshape(1, pN)
    out = pl.pallas_call(
        _linear_sigmoid_kernel,
        out_shape=jax.ShapeDtypeStruct((pM, pN), jnp.float32),
        grid=(1,),
        in_specs=[pl.BlockSpec((pM, pK), lambda i: (0, 0)),
                  pl.BlockSpec((pK, pN), lambda i: (0, 0)),
                  pl.BlockSpec((1, pN), lambda i: (0, 0))],
        out_specs=pl.BlockSpec((pM, pN), lambda i: (0, 0)),
    )(xp, wp, bp)
    return out[:M, :N]


# ----------------------------- JAX glue -----------------------------------

def extract_patches(x, kh, kw, stride, pad, pad_value=0.0):
    """x: (N, H, W, C) -> (N, OH, OW, kh*kw, C) patches (pure data movement)."""
    N, H, W, C = x.shape
    xp = jnp.pad(x, ((0, 0), (pad, pad), (pad, pad), (0, 0)),
                 constant_values=pad_value)
    OH = (H + 2 * pad - kh) // stride + 1
    OW = (W + 2 * pad - kw) // stride + 1
    cols = []
    for i in range(kh):
        for j in range(kw):
            cols.append(xp[:, i:i + stride * (OH - 1) + 1:stride,
                           j:j + stride * (OW - 1) + 1:stride, :])
    patches = jnp.stack(cols, axis=3)
    return patches, OH, OW


@functools.partial(jax.jit,
                   static_argnames=("stride", "pad", "out_relu", "out_dtype"))
def conv2d(x, w, *, stride, pad, in_bn=None, out_bn=None, out_relu=False,
           out_dtype=jnp.bfloat16):
    """x: NHWC, w: (OutC, InC, KH, KW) (PyTorch layout), no bias.

    in_bn : BN(+ReLU) applied to the conv *input* (fused on the A operand);
            only valid for 1x1 convs (no spatial padding involved).
    out_bn/out_relu : BN (+ReLU) applied to the conv *output* (fused epilogue).
    """
    OutC, InC, KH, KW = w.shape
    assert in_bn is None or (KH == 1 and KW == 1), \
        "input-BN fusion only supported for 1x1 convs"
    N = x.shape[0]
    if KH == 1 and KW == 1 and stride == 1 and pad == 0:
        OH, OW = x.shape[1], x.shape[2]
        a = x.reshape(N * OH * OW, InC)
    else:
        # TODO(synk): stream the 3x3 conv directly from the NHWC activation
        # (shifted-window DMA) instead of materializing im2col patches.
        patches, OH, OW = extract_patches(x, KH, KW, stride, pad)
        a = patches.reshape(N * OH * OW, KH * KW * InC)
    b = jnp.transpose(w, (2, 3, 1, 0)).reshape(KH * KW * InC, OutC)

    in_scale = in_shift = out_scale = out_shift = None
    if in_bn is not None:
        in_scale, in_shift = _bn_fold(in_bn)
    if out_bn is not None:
        out_scale, out_shift = _bn_fold(out_bn)

    y = fused_matmul(a, b, in_scale, in_shift, out_scale, out_shift,
                     out_relu=out_relu, out_dtype=out_dtype)
    return y.reshape(N, OH, OW, OutC)


@functools.partial(jax.jit, static_argnames=("k", "stride", "pad"))
def maxpool2d(x, *, k, stride, pad):
    N, H, W, C = x.shape
    p, OH, OW = extract_patches(x, k, k, stride, pad, pad_value=-jnp.inf)
    p = p.reshape(N * OH * OW, k * k, C)
    y = pool_reduce(p, "max")
    return y.reshape(N, OH, OW, C)


@functools.partial(jax.jit, static_argnames=("k", "stride"))
def avgpool2d(x, *, k, stride):
    N, H, W, C = x.shape
    p, OH, OW = extract_patches(x, k, k, stride, 0)
    p = p.reshape(N * OH * OW, k * k, C)
    y = pool_reduce(p, "mean")
    return y.reshape(N, OH, OW, C)


# ----------------------------- Parameters ---------------------------------

GROWTH = 32
BN_SIZE = 4
BLOCK_CONFIG = (6, 12, 24, 16)


def densenet121_params(key):
    keys = iter(jax.random.split(key, 4096))

    def conv_w(out_c, in_c, kh, kw):
        fan_in = in_c * kh * kw
        return (jax.random.normal(next(keys), (out_c, in_c, kh, kw), jnp.float32)
                * jnp.sqrt(1.0 / fan_in))

    def bn_p(c):
        return dict(
            gamma=1.0 + 0.1 * jax.random.normal(next(keys), (c,), jnp.float32),
            beta=0.1 * jax.random.normal(next(keys), (c,), jnp.float32),
            mean=0.1 * jax.random.normal(next(keys), (c,), jnp.float32),
            var=1.0 + 0.1 * jax.random.uniform(next(keys), (c,), jnp.float32),
        )

    params = {}
    params["conv0"] = conv_w(64, 1, 7, 7)   # modified first conv: 1 input channel
    params["norm0"] = bn_p(64)

    num_feat = 64
    blocks = []
    transitions = []
    for bi, n_layers in enumerate(BLOCK_CONFIG):
        layers = []
        for li in range(n_layers):
            in_c = num_feat + li * GROWTH
            layers.append(dict(
                norm1=bn_p(in_c),
                conv1=conv_w(BN_SIZE * GROWTH, in_c, 1, 1),
                norm2=bn_p(BN_SIZE * GROWTH),
                conv2=conv_w(GROWTH, BN_SIZE * GROWTH, 3, 3),
            ))
        blocks.append(layers)
        num_feat = num_feat + n_layers * GROWTH
        if bi != len(BLOCK_CONFIG) - 1:
            transitions.append(dict(
                norm=bn_p(num_feat),
                conv=conv_w(num_feat // 2, num_feat, 1, 1),
            ))
            num_feat = num_feat // 2

    params["blocks"] = blocks
    params["transitions"] = transitions
    params["norm5"] = bn_p(num_feat)  # num_feat == 1024
    params["classifier"] = dict(
        w=jax.random.normal(next(keys), (num_feat, 7), jnp.float32)
        * jnp.sqrt(1.0 / num_feat),
        b=0.01 * jax.random.normal(next(keys), (7,), jnp.float32),
    )
    return params


# ----------------------------- Forward pass --------------------------------

def densenet121_forward(params, x_nchw):
    x = jnp.transpose(x_nchw, (0, 2, 3, 1)).astype(jnp.float32)  # NCHW -> NHWC

    # Stem: conv0 (+ fused norm0 + relu0) -> pool0
    x = conv2d(x, params["conv0"], stride=2, pad=3,
               out_bn=params["norm0"], out_relu=True)
    x = maxpool2d(x, k=3, stride=2, pad=1)

    # Dense blocks + transitions
    for bi, layers in enumerate(params["blocks"]):
        for layer in layers:
            # norm1+relu fused into conv1's input side,
            # norm2+relu fused into conv1's output epilogue.
            y = conv2d(x, layer["conv1"], stride=1, pad=0,
                       in_bn=layer["norm1"],
                       out_bn=layer["norm2"], out_relu=True)
            y = conv2d(y, layer["conv2"], stride=1, pad=1)   # 3x3, growth=32
            x = jnp.concatenate([x, y], axis=-1)             # dense connectivity
        if bi < len(params["transitions"]):
            t = params["transitions"][bi]
            x = conv2d(x, t["conv"], stride=1, pad=0, in_bn=t["norm"])
            x = avgpool2d(x, k=2, stride=2)

    # Head: norm5 -> relu -> adaptive avg pool (1,1) -> classifier -> sigmoid
    feats = global_avgpool_bn_relu(x, params["norm5"])        # (N, 1024) f32
    out = linear_sigmoid(feats, params["classifier"]["w"],
                         params["classifier"]["b"])
    return out                                                # (N, 7)


if __name__ == "__main__":
    key = jax.random.PRNGKey(0)
    kp, kx = jax.random.split(key)
    params = densenet121_params(kp)
    # small input consistent with the modified conv0 (1 input channel), NCHW
    x = jax.random.normal(kx, (2, 1, 32, 32), jnp.float32)
    out = densenet121_forward(params, x)
    out = jax.block_until_ready(out)
    assert out.shape == (2, 7), out.shape
    assert bool(jnp.all(jnp.isfinite(out)))
    assert bool(jnp.all((out >= 0.0) & (out <= 1.0)))
    print("KERNEL_OK")
</pallas_src>

<mosaic_0001>
module attributes {stable_mosaic.version = 11 : i64} {
  func.func @kernel(%arg0: i32, %arg1: i32, %arg2: i32, %arg3: memref<256x128xbf16, #tpu.memory_space<vmem>>, %arg4: memref<128x128xbf16, #tpu.memory_space<vmem>>, %arg5: memref<1x128xf32, #tpu.memory_space<vmem>>, %arg6: memref<1x128xf32, #tpu.memory_space<vmem>>, %arg7: memref<256x128xbf16, #tpu.memory_space<vmem>>, %arg8: memref<256x128xf32, #tpu.memory_space<vmem>>) attributes {dimension_semantics = [#tpu.dimension_semantics<parallel>, #tpu.dimension_semantics<parallel>, #tpu.dimension_semantics<arbitrary>], iteration_bounds = array<i64: 2, 1, 1>, scalar_prefetch = 0 : i64, scratch_operands = 1 : i64, tpu.core_type = #tpu.core_type<tc>, window_params = [{transform_indices = @transform_0, window_bounds = array<i64: 256, 128>}, {transform_indices = @transform_1, window_bounds = array<i64: 128, 128>}, {transform_indices = @transform_2, window_bounds = array<i64: 1, 128>}, {transform_indices = @transform_3, window_bounds = array<i64: 1, 128>}, {transform_indices = @transform_4, window_bounds = array<i64: 256, 128>}]} {
    %c0_i32 = arith.constant 0 : i32
    %0 = arith.cmpi eq, %arg2, %c0_i32 : i32
    %1 = arith.extui %0 : i1 to i32
    %c0_i32_0 = arith.constant 0 : i32
    %2 = arith.cmpi ne, %1, %c0_i32_0 : i32
    scf.if %2 {
      %cst_10 = arith.constant 0.000000e+00 : f32
      %12 = vector.broadcast %cst_10 : f32 to vector<256x128xf32>
      %c0_11 = arith.constant 0 : index
      %c0_12 = arith.constant 0 : index
      %13 = vector.load %arg8[%c0_11, %c0_12] : memref<256x128xf32, #tpu.memory_space<vmem>>, vector<256x128xf32>
      tpu.vector_store %arg8[%c0_11, %c0_12], %12 {strides = array<i32>} : memref<256x128xf32, #tpu.memory_space<vmem>>, vector<256x128xf32>,
    } else {
    }
    %c0 = arith.constant 0 : index
    %c0_1 = arith.constant 0 : index
    %3 = vector.load %arg3[%c0, %c0_1] : memref<256x128xbf16, #tpu.memory_space<vmem>>, vector<256x128xbf16>
    %c0_2 = arith.constant 0 : index
    %c0_3 = arith.constant 0 : index
    %4 = vector.load %arg8[%c0_2, %c0_3] : memref<256x128xf32, #tpu.memory_space<vmem>>, vector<256x128xf32>
    %c0_4 = arith.constant 0 : index
    %c0_5 = arith.constant 0 : index
    %5 = vector.load %arg4[%c0_4, %c0_5] : memref<128x128xbf16, #tpu.memory_space<vmem>>, vector<128x128xbf16>
    %cst = arith.constant dense<0.000000e+00> : vector<256x128xf32>
    %6 = tpu.matmul %3, %5, %cst {dimension_numbers = #tpu.dot_dimension_numbers<[1], [0], [0], [1], [0, 0, 1, 1], [], []>} : vector<256x128xbf16>, vector<128x128xbf16>, vector<256x128xf32> -> vector<256x128xf32>
    %7 = arith.addf %4, %6 : vector<256x128xf32>
    %c0_6 = arith.constant 0 : index
    %c0_7 = arith.constant 0 : index
    %8 = vector.load %arg8[%c0_6, %c0_7] : memref<256x128xf32, #tpu.memory_space<vmem>>, vector<256x128xf32>
    tpu.vector_store %arg8[%c0_6, %c0_7], %7 {strides = array<i32>} : memref<256x128xf32, #tpu.memory_space<vmem>>, vector<256x128xf32>,
    %c0_i32_8 = arith.constant 0 : i32
    %9 = arith.cmpi eq, %arg2, %c0_i32_8 : i32
    %10 = arith.extui %9 : i1 to i32
    %c0_i32_9 = arith.constant 0 : i32
    %11 = arith.cmpi ne, %10, %c0_i32_9 : i32
    scf.if %11 {
      %c0_10 = arith.constant 0 : index
      %c0_11 = arith.constant 0 : index
      %12 = vector.load %arg8[%c0_10, %c0_11] : memref<256x128xf32, #tpu.memory_space<vmem>>, vector<256x128xf32>
      %c0_12 = arith.constant 0 : index
      %c0_13 = arith.constant 0 : index
      %13 = vector.load %arg5[%c0_12, %c0_13] : memref<1x128xf32, #tpu.memory_space<vmem>>, vector<1x128xf32>
      %14 = vector.broadcast %13 : vector<1x128xf32> to vector<256x128xf32>
      %15 = arith.mulf %12, %14 : vector<256x128xf32>
      %c0_14 = arith.constant 0 : index
      %c0_15 = arith.constant 0 : index
      %16 = vector.load %arg6[%c0_14, %c0_15] : memref<1x128xf32, #tpu.memory_space<vmem>>, vector<1x128xf32>
      %17 = vector.broadcast %16 : vector<1x128xf32> to vector<256x128xf32>
      %18 = arith.addf %15, %17 : vector<256x128xf32>
      %cst_16 = arith.constant 0.000000e+00 : f32
      %19 = vector.broadcast %cst_16 : f32 to vector<256x128xf32>
      %20 = arith.maximumf %18, %19 : vector<256x128xf32>
      %21 = arith.truncf %20 : vector<256x128xf32> to vector<256x128xbf16>
      %c0_17 = arith.constant 0 : index
      %c0_18 = arith.constant 0 : index
      %22 = vector.load %arg7[%c0_17, %c0_18] : memref<256x128xbf16, #tpu.memory_space<vmem>>, vector<256x128xbf16>
      tpu.vector_store %arg7[%c0_17, %c0_18], %21 {strides = array<i32>} : memref<256x128xbf16, #tpu.memory_space<vmem>>, vector<256x128xbf16>,
    } else {
    }
    return
  }
  func.func @transform_0(%arg0: i32, %arg1: i32, %arg2: i32) -> (i32, i32) {
    %c0_i32 = arith.constant 0 : i32
    return %arg0, %arg2 : i32, i32
  }
  func.func @transform_1(%arg0: i32, %arg1: i32, %arg2: i32) -> (i32, i32) {
    %c0_i32 = arith.constant 0 : i32
    return %arg2, %arg1 : i32, i32
  }
  func.func @transform_2(%arg0: i32, %arg1: i32, %arg2: i32) -> (i32, i32) {
    %c0_i32 = arith.constant 0 : i32
    %c0_i32_0 = arith.constant 0 : i32
    return %c0_i32, %arg1 : i32, i32
  }
  func.func @transform_3(%arg0: i32, %arg1: i32, %arg2: i32) -> (i32, i32) {
    %c0_i32 = arith.constant 0 : i32
    %c0_i32_0 = arith.constant 0 : i32
    return %c0_i32, %arg1 : i32, i32
  }
  func.func @transform_4(%arg0: i32, %arg1: i32, %arg2: i32) -> (i32, i32) {
    %c0_i32 = arith.constant 0 : i32
    return %arg0, %arg1 : i32, i32
  }
}

</mosaic_0001>

<bundles_post_ra>
// kernel: fused_matmul.1
= control target key start
LH: loop header
LB: loop body
LE: loop exit
PB: predicated region body
PF: predicated region fallthrough
CT: control target
= control target key end

     0   :  { %s1598_s15 = smov 0   ;;  %s1600_s16 = smov 0   ;;  %s1772_s0 = inlined_call_operand.vmem [shape: bf16[512,128], index: 0, kind: input, shape index: {}]   ;;  %s1773_s1 = inlined_call_operand.vmem [shape: bf16[128,128], index: 1, kind: input, shape index: {}]   ;;  %s1774_s2 = inlined_call_operand.vmem [shape: f32[1,128], index: 2, kind: input, shape index: {}]   ;;  %s1775_s3 = inlined_call_operand.vmem [shape: f32[1,128], index: 3, kind: input, shape index: {}]   ;;  %s1776_s4 = inlined_call_operand.vmem [shape: bf16[512,128], index: 4, kind: output, shape index: {}]  }
   0x1   :  { %s1602_s17 = smov 0  }
   0x2 LB: > { %s33_s18 = sadd.s32 1, %s1567_s16  ;;  %p1221_p0 = scmp.ge.s32.totalorder %s1571_s17, 1  ;;  %s1571_s17 = sphi %s1602_s17, %s14_s17   ;;  %s1567_s16 = sphi %s1600_s16, %s1778_s16   ;;  %s1563_s15 = sphi %s1598_s15, %s1777_s15  }
   0x3   : > { %p35_p1 = scmp.ge.s32.totalorder %s33_s18, 2  ;;  %p221_p2 = scmp.lt.s32.totalorder %s1571_s17, 3 }
   0x5   : > { %s1780_s18 = smov (%p35_p1, %s33_s18), 0  ;;  %p222_p3 = pnand %p1221_p0, %p221_p2 }
   0x6   : > { %v1525_v0 = vld [vmem:[%s1773_s1] sm:$0xff] (!%p222_p3)   ;;  %s1222_s21 = sshll.u32 (!%p222_p3), %s1563_s15, 5  ;;  %v1526_v1 = vld [vmem:[%s1773_s1 + $0x8] sm:$0xff] (!%p222_p3)   ;;  %v1527_v2 = vld [vmem:[%s1773_s1 + $0x10] sm:$0xff] (!%p222_p3)  }
   0x7   : > { %225 = sbr.rel (%p222_p3) target bundleno = 288 (0x120), region = 36  ;;  %p268_p4 = scmp.lt.s32.totalorder (!%p222_p3), %s1222_s21, 63  ;;  %1437 = vmatprep.subr.bf16.mxu0 (!%p222_p3), %v1525_v0  ;;  %1485 = vmatprep.subr.bf16.mxu1 (!%p222_p3), %v1525_v0  ;;  %v1528_v3 = vld [vmem:[%s1773_s1 + $0x18] sm:$0xff] (!%p222_p3)   ;;  %v1529_v6 = vld [vmem:[%s1773_s1 + $0x20] sm:$0xff] (!%p222_p3)   ;;  %v1530_v7 = vld [vmem:[%s1773_s1 + $0x28] sm:$0xff] (!%p222_p3)  }
   0x8   : > { %1438 = vmatpush3.bf16.msra.mxu0 (!%p222_p3), %v1525_v0  ;;  %1493 = vmatpush3.bf16.msra.mxu1 (!%p222_p3), %v1525_v0  ;;  %v1531_v8 = vld [vmem:[%s1773_s1 + $0x30] sm:$0xff] (!%p222_p3)   ;;  %v1532_v9 = vld [vmem:[%s1773_s1 + $0x38] sm:$0xff] (!%p222_p3)   ;;  %v1669_v24 = vld [vmem:[%s1774_s2] ss:$0 sm:$0xff] (!%p222_p3) }
   0x9   : > { %1439 = vmatprep.subr.bf16.mxu0 (!%p222_p3), %v1526_v1  ;;  %1486 = vmatprep.subr.bf16.mxu1 (!%p222_p3), %v1526_v1  ;;  %v1674_v26 = vld [vmem:[%s1775_s3] ss:$0 sm:$0xff] (!%p222_p3) }
   0xc   : > { %1440 = vmatpush3.bf16.msra.mxu0 (!%p222_p3), %v1526_v1  ;;  %1494 = vmatpush3.bf16.msra.mxu1 (!%p222_p3), %v1526_v1 }
   0xd   : > { %1441 = vmatprep.subr.bf16.mxu0 (!%p222_p3), %v1527_v2  ;;  %1487 = vmatprep.subr.bf16.mxu1 (!%p222_p3), %v1527_v2 }
   0xe   : > { %s1782_s21 = smov (!%p268_p4, %s1222_s21), 63 }
   0xf   : > { %s1223_s26 = sshll.u32 %s1782_s21, 2 }
  0x10   : > { %s1633_s29 = scalar_lea.vmem %s1772_s0, %s1223_s26  ;;  %1442 = vmatpush3.bf16.msra.mxu0 %v1527_v2  ;;  %1495 = vmatpush3.bf16.msra.mxu1 %v1527_v2  ;;  %s1697_s24 = scalar_lea.vmem %s1776_s4, %s1223_s26 }
  0x11   : > { %v1533_v4 = vld [vmem:[%s1633_s29] sm:$0xff]   ;;  %1443 = vmatprep.subr.bf16.mxu0 %v1528_v3  ;;  %1488 = vmatprep.subr.bf16.mxu1 %v1528_v3  ;;  %v1535_v10 = vld [vmem:[%s1633_s29 + $0x8] sm:$0xff]   ;;  %v1537_v12 = vld [vmem:[%s1633_s29 + $0x10] sm:$0xff]  }
  0x12   : > { %v1534_v5 = vld [vmem:[%s1633_s29 + $0x40] sm:$0xff]   ;;  %1453 = vmatprep.mubr.bf16.mxu0 %v1533_v4  ;;  %v1536_v11 = vld [vmem:[%s1633_s29 + $0x48] sm:$0xff]   ;;  %v1538_v13 = vld [vmem:[%s1633_s29 + $0x50] sm:$0xff]  }
  0x13   : > { %1469 = vmatprep.mubr.bf16.mxu1 %v1534_v5  ;;  %v1539_v14 = vld [vmem:[%s1633_s29 + $0x18] sm:$0xff]   ;;  %v1541_v16 = vld [vmem:[%s1633_s29 + $0x20] sm:$0xff]   ;;  %v1543_v18 = vld [vmem:[%s1633_s29 + $0x28] sm:$0xff]  }
  0x14   : > { %1444 = vmatpush3.bf16.msra.mxu0 %v1528_v3  ;;  %1496 = vmatpush3.bf16.msra.mxu1 %v1528_v3  ;;  %v1540_v15 = vld [vmem:[%s1633_s29 + $0x58] sm:$0xff]   ;;  %v1542_v17 = vld [vmem:[%s1633_s29 + $0x60] sm:$0xff]   ;;  %v1544_v19 = vld [vmem:[%s1633_s29 + $0x68] sm:$0xff]  }
  0x15   : > { %1445 = vmatprep.subr.bf16.mxu0 %v1529_v6  ;;  %1489 = vmatprep.subr.bf16.mxu1 %v1529_v6  ;;  %v1545_v20 = vld [vmem:[%s1633_s29 + $0x30] sm:$0xff]   ;;  %v1547_v22 = vld [vmem:[%s1633_s29 + $0x38] sm:$0xff]  }
  0x16   : > { %v1546_v21 = vld [vmem:[%s1633_s29 + $0x70] sm:$0xff]   ;;  %v1548_v23 = vld [vmem:[%s1633_s29 + $0x78] sm:$0xff]  }
  0x18   : > { %1446 = vmatpush3.bf16.msra.mxu0 %v1529_v6  ;;  %1497 = vmatpush3.bf16.msra.mxu1 %v1529_v6 }
  0x19   : > { %1447 = vmatprep.subr.bf16.mxu0 %v1530_v7  ;;  %1490 = vmatprep.subr.bf16.mxu1 %v1530_v7 }
  0x1c   : > { %1448 = vmatpush3.bf16.msra.mxu0 %v1530_v7  ;;  %1498 = vmatpush3.bf16.msra.mxu1 %v1530_v7 }
  0x1d   : > { %1449 = vmatprep.subr.bf16.mxu0 %v1531_v8  ;;  %1491 = vmatprep.subr.bf16.mxu1 %v1531_v8 }
  0x20   : > { %1450 = vmatpush3.bf16.msra.mxu0 %v1531_v8  ;;  %1499 = vmatpush3.bf16.msra.mxu1 %v1531_v8 }
  0x21   : > { %1451 = vmatprep.subr.bf16.mxu0 %v1532_v9  ;;  %1492 = vmatprep.subr.bf16.mxu1 %v1532_v9 }
  0x24   : > { %1452 = vmatpush3.bf16.msra.mxu0 %v1532_v9  ;;  %1500 = vmatpush3.bf16.msra.mxu1 %v1532_v9 }
  0x27   : > { %1454 = vmatmul.mubr.bf16.vlgmr.msra.gmra.mrb[0].mxu0 %v1535_v10  ;;  %1470 = vmatmul.mubr.bf16.vlgmr.msra.gmra.mrb[0].mxu1 %v1536_v11 }
  0x28   : > { %1457 = vmatprep.mubr.bf16.mxu0 %v1537_v12  ;;  %1473 = vmatprep.mubr.bf16.mxu1 %v1538_v13 }
  0x2f   : > { %1458 = vmatmul.mubr.bf16.gmra.mrb[4].mxu0 %v1539_v14  ;;  %1474 = vmatmul.mubr.bf16.gmra.mrb[4].mxu1 %v1540_v15 }
  0x30   : > { %1461 = vmatprep.mubr.bf16.mxu0 %v1541_v16  ;;  %1477 = vmatprep.mubr.bf16.mxu1 %v1542_v17 }
  0x37   : > { %1462 = vmatmul.mubr.bf16.gmra.mrb[8].mxu0 %v1543_v18  ;;  %1478 = vmatmul.mubr.bf16.gmra.mrb[8].mxu1 %v1544_v19 }
  0x38   : > { %1465 = vmatprep.mubr.bf16.mxu0 %v1545_v20  ;;  %1481 = vmatprep.mubr.bf16.mxu1 %v1546_v21 }
  0x3f   : > { %1466 = vmatmul.mubr.bf16.gmra.mrb[12].mxu0 %v1547_v22  ;;  %1482 = vmatmul.mubr.bf16.gmra.mrb[12].mxu1 %v1548_v23 }
  0xfa   : > { %v1455_v25 = vpop.f32.mrb[0].mxu0  ;;  %v1471_v27 = vpop.f32.mrb[0].mxu1 }
  0xfb   : > { %v830_v28 = vmul.f32 %v1455_v25, %v1669_v24  ;;  %v846_v29 = vmul.f32 %v1471_v27, %v1669_v24  ;;  %v595_v30 = vpop.f32.mrb[1].mxu0  ;;  %v659_v31 = vpop.f32.mrb[1].mxu1 }
  0xfc   : > { %v828_v32 = vmul.f32 %v1669_v24, %v595_v30  ;;  %v844_v33 = vmul.f32 %v1669_v24, %v659_v31  ;;  %v1456_v34 = vpop.f32.mrb[2].mxu0  ;;  %v1472_v35 = vpop.f32.mrb[2].mxu1 }
  0xfd   : > { %v869_v36 = vadd.f32 %v1674_v26, %v830_v28  ;;  %v885_v37 = vadd.f32 %v1674_v26, %v846_v29  ;;  %v831_v38 = vmul.f32 %v1456_v34, %v1669_v24  ;;  %v847_v39 = vmul.f32 %v1472_v35, %v1669_v24  ;;  %v598_v40 = vpop.f32.mrb[3].mxu0  ;;  %v662_v41 = vpop.f32.mrb[3].mxu1 }
  0xfe   : > { %v867_v42 = vadd.f32 %v1674_v26, %v828_v32  ;;  %v883_v43 = vadd.f32 %v1674_v26, %v844_v33  ;;  %v829_v44 = vmul.f32 %v1669_v24, %v598_v40  ;;  %v845_v45 = vmul.f32 %v1669_v24, %v662_v41 }
  0xff   : > { %v870_v46 = vadd.f32 %v1674_v26, %v831_v38  ;;  %v886_v47 = vadd.f32 %v1674_v26, %v847_v39  ;;  %v901_v50 = vmax.f32 %v869_v36, 0.0  ;;  %v917_v51 = vmax.f32 %v885_v37, 0.0 }
 0x100   : > { %v868_v48 = vadd.f32 %v1674_v26, %v829_v44  ;;  %v884_v49 = vadd.f32 %v1674_v26, %v845_v45  ;;  %v899_v54 = vmax.f32 %v867_v42, 0.0  ;;  %v915_v55 = vmax.f32 %v883_v43, 0.0 }
 0x101   : > { %v902_v52 = vmax.f32 %v870_v46, 0.0  ;;  %v918_v53 = vmax.f32 %v886_v47, 0.0 }
 0x102   : > { %v900_v56 = vmax.f32 %v868_v48, 0.0  ;;  %v916_v57 = vmax.f32 %v884_v49, 0.0  ;;  %v1459_v58 = vpop.f32.mrb[4].mxu0  ;;  %v1475_v59 = vpop.f32.mrb[4].mxu1 }
 0x103   : > { %v1326_v60 = vpack.c.bf16 %v902_v52, %v901_v50  ;;  %v1366_v61 = vpack.c.bf16 %v918_v53, %v917_v51  ;;  %v834_v62 = vmul.f32 %v1459_v58, %v1669_v24  ;;  %v850_v63 = vmul.f32 %v1475_v59, %v1669_v24  ;;  %v611_v0 = vpop.f32.mrb[5].mxu0  ;;  %v675_v1 = vpop.f32.mrb[5].mxu1 }
 0x104   : > { %v1321_v2 = vpack.c.bf16 %v900_v56, %v899_v54  ;;  %v1361_v3 = vpack.c.bf16 %v916_v57, %v915_v55  ;;  %v832_v4 = vmul.f32 %v1669_v24, %v611_v0  ;;  %v848_v5 = vmul.f32 %v1669_v24, %v675_v1  ;;  %v1460_v6 = vpop.f32.mrb[6].mxu0  ;;  %v1476_v7 = vpop.f32.mrb[6].mxu1 }
 0x105   : > { %1398 = vst [vmem:[%s1697_s24 + $0x8] sm:$0xff] %v1326_v60   ;;  %1406 = vst [vmem:[%s1697_s24 + $0x48] sm:$0xff] %v1366_v61   ;;  %v873_v8 = vadd.f32 %v1674_v26, %v834_v62  ;;  %v889_v9 = vadd.f32 %v1674_v26, %v850_v63  ;;  %v835_v10 = vmul.f32 %v1460_v6, %v1669_v24  ;;  %v614_v12 = vpop.f32.mrb[7].mxu0  ;;  %v678_v13 = vpop.f32.mrb[7].mxu1 }
 0x106   : > { %v851_v11 = vmul.f32 %v1476_v7, %v1669_v24  ;;  %1322 = vst [vmem:[%s1697_s24] sm:$0xff] %v1321_v2   ;;  %1405 = vst [vmem:[%s1697_s24 + $0x40] sm:$0xff] %v1361_v3   ;;  %v871_v14 = vadd.f32 %v1674_v26, %v832_v4  ;;  %v887_v15 = vadd.f32 %v1674_v26, %v848_v5 }
 0x107   : > { %v833_v16 = vmul.f32 %v1669_v24, %v614_v12  ;;  %v849_v17 = vmul.f32 %v1669_v24, %v678_v13  ;;  %v874_v18 = vadd.f32 %v1674_v26, %v835_v10  ;;  %v905_v22 = vmax.f32 %v873_v8, 0.0 }
 0x108   : > { %v890_v19 = vadd.f32 %v1674_v26, %v851_v11  ;;  %v921_v23 = vmax.f32 %v889_v9, 0.0  ;;  %v903_v28 = vmax.f32 %v871_v14, 0.0  ;;  %v919_v29 = vmax.f32 %v887_v15, 0.0 }
 0x109   : > { %v872_v20 = vadd.f32 %v1674_v26, %v833_v16  ;;  %v888_v21 = vadd.f32 %v1674_v26, %v849_v17  ;;  %v906_v25 = vmax.f32 %v874_v18, 0.0 }
 0x10a   : > { %v922_v27 = vmax.f32 %v890_v19, 0.0  ;;  %v1463_v32 = vpop.f32.mrb[8].mxu0  ;;  %v1479_v33 = vpop.f32.mrb[8].mxu1 }
 0x10b   : > { %v904_v30 = vmax.f32 %v872_v20, 0.0  ;;  %v920_v31 = vmax.f32 %v888_v21, 0.0  ;;  %v1336_v34 = vpack.c.bf16 %v906_v25, %v905_v22  ;;  %v838_v36 = vmul.f32 %v1463_v32, %v1669_v24  ;;  %v627_v38 = vpop.f32.mrb[9].mxu0  ;;  %v691_v39 = vpop.f32.mrb[9].mxu1 }
 0x10c   : > { %v1376_v35 = vpack.c.bf16 %v922_v27, %v921_v23  ;;  %v854_v37 = vmul.f32 %v1479_v33, %v1669_v24  ;;  %v836_v42 = vmul.f32 %v1669_v24, %v627_v38  ;;  %v852_v43 = vmul.f32 %v1669_v24, %v691_v39  ;;  %v1464_v44 = vpop.f32.mrb[10].mxu0  ;;  %v1480_v45 = vpop.f32.mrb[10].mxu1 }
 0x10d   : > { %v1331_v40 = vpack.c.bf16 %v904_v30, %v903_v28  ;;  %v1371_v41 = vpack.c.bf16 %v920_v31, %v919_v29  ;;  %1400 = vst [vmem:[%s1697_s24 + $0x18] sm:$0xff] %v1336_v34   ;;  %v877_v46 = vadd.f32 %v1674_v26, %v838_v36  ;;  %v839_v48 = vmul.f32 %v1464_v44, %v1669_v24  ;;  %v630_v50 = vpop.f32.mrb[11].mxu0  ;;  %v694_v51 = vpop.f32.mrb[11].mxu1 }
 0x10e   : > { %1408 = vst [vmem:[%s1697_s24 + $0x58] sm:$0xff] %v1376_v35   ;;  %v893_v47 = vadd.f32 %v1674_v26, %v854_v37  ;;  %v855_v49 = vmul.f32 %v1480_v45, %v1669_v24  ;;  %v875_v52 = vadd.f32 %v1674_v26, %v836_v42  ;;  %v891_v53 = vadd.f32 %v1674_v26, %v852_v43 }
 0x10f   : > { %1399 = vst [vmem:[%s1697_s24 + $0x10] sm:$0xff] %v1331_v40   ;;  %1407 = vst [vmem:[%s1697_s24 + $0x50] sm:$0xff] %v1371_v41   ;;  %v837_v54 = vmul.f32 %v1669_v24, %v630_v50  ;;  %v853_v55 = vmul.f32 %v1669_v24, %v694_v51  ;;  %v878_v56 = vadd.f32 %v1674_v26, %v839_v48  ;;  %v909_v60 = vmax.f32 %v877_v46, 0.0 }
 0x110   : > { %v894_v57 = vadd.f32 %v1674_v26, %v855_v49  ;;  %v925_v61 = vmax.f32 %v893_v47, 0.0  ;;  %v907_v0 = vmax.f32 %v875_v52, 0.0  ;;  %v923_v1 = vmax.f32 %v891_v53, 0.0 }
 0x111   : > { %v876_v58 = vadd.f32 %v1674_v26, %v837_v54  ;;  %v892_v59 = vadd.f32 %v1674_v26, %v853_v55  ;;  %v910_v62 = vmax.f32 %v878_v56, 0.0 }
 0x112   : > { %v926_v63 = vmax.f32 %v894_v57, 0.0  ;;  %v1467_v4 = vpop.f32.mrb[12].mxu0  ;;  %v1483_v5 = vpop.f32.mrb[12].mxu1 }
 0x113   : > { %v908_v2 = vmax.f32 %v876_v58, 0.0  ;;  %v924_v3 = vmax.f32 %v892_v59, 0.0  ;;  %v1346_v6 = vpack.c.bf16 %v910_v62, %v909_v60  ;;  %v842_v8 = vmul.f32 %v1467_v4, %v1669_v24  ;;  %v643_v10 = vpop.f32.mrb[13].mxu0  ;;  %v707_v11 = vpop.f32.mrb[13].mxu1 }
 0x114   : > { %v1386_v7 = vpack.c.bf16 %v926_v63, %v925_v61  ;;  %v858_v9 = vmul.f32 %v1483_v5, %v1669_v24  ;;  %v840_v14 = vmul.f32 %v1669_v24, %v643_v10  ;;  %v856_v15 = vmul.f32 %v1669_v24, %v707_v11  ;;  %v1468_v16 = vpop.f32.mrb[14].mxu0  ;;  %v1484_v17 = vpop.f32.mrb[14].mxu1 }
 0x115   : > { %v1341_v12 = vpack.c.bf16 %v908_v2, %v907_v0  ;;  %v1381_v13 = vpack.c.bf16 %v924_v3, %v923_v1  ;;  %1402 = vst [vmem:[%s1697_s24 + $0x28] sm:$0xff] %v1346_v6   ;;  %v881_v18 = vadd.f32 %v1674_v26, %v842_v8  ;;  %v843_v20 = vmul.f32 %v1468_v16, %v1669_v24  ;;  %v646_v22 = vpop.f32.mrb[15].mxu0  ;;  %v710_v23 = vpop.f32.mrb[15].mxu1 }
 0x116   : > { %1410 = vst [vmem:[%s1697_s24 + $0x68] sm:$0xff] %v1386_v7   ;;  %v897_v19 = vadd.f32 %v1674_v26, %v858_v9  ;;  %v859_v21 = vmul.f32 %v1484_v17, %v1669_v24  ;;  %v879_v25 = vadd.f32 %v1674_v26, %v840_v14  ;;  %v895_v27 = vadd.f32 %v1674_v26, %v856_v15 }
 0x117   : > { %1401 = vst [vmem:[%s1697_s24 + $0x20] sm:$0xff] %v1341_v12   ;;  %1409 = vst [vmem:[%s1697_s24 + $0x60] sm:$0xff] %v1381_v13   ;;  %v841_v28 = vmul.f32 %v1669_v24, %v646_v22  ;;  %v857_v29 = vmul.f32 %v1669_v24, %v710_v23  ;;  %v882_v30 = vadd.f32 %v1674_v26, %v843_v20  ;;  %v913_v34 = vmax.f32 %v881_v18, 0.0 }
 0x118   : > { %v898_v31 = vadd.f32 %v1674_v26, %v859_v21  ;;  %v929_v35 = vmax.f32 %v897_v19, 0.0  ;;  %v911_v38 = vmax.f32 %v879_v25, 0.0  ;;  %v927_v39 = vmax.f32 %v895_v27, 0.0 }
 0x119   : > { %v880_v32 = vadd.f32 %v1674_v26, %v841_v28  ;;  %v896_v33 = vadd.f32 %v1674_v26, %v857_v29  ;;  %v914_v36 = vmax.f32 %v882_v30, 0.0 }
 0x11a   : > { %v930_v37 = vmax.f32 %v898_v31, 0.0 }
 0x11b   : > { %v912_v40 = vmax.f32 %v880_v32, 0.0  ;;  %v928_v24 = vmax.f32 %v896_v33, 0.0  ;;  %v1356_v41 = vpack.c.bf16 %v914_v36, %v913_v34 }
 0x11c   : > { %v1396_v42 = vpack.c.bf16 %v930_v37, %v929_v35 }
 0x11d   : > { %v1351_v43 = vpack.c.bf16 %v912_v40, %v911_v38  ;;  %v1391_v44 = vpack.c.bf16 %v928_v24, %v927_v39  ;;  %1404 = vst [vmem:[%s1697_s24 + $0x38] sm:$0xff] %v1356_v41  }
 0x11e   : > { %1412 = vst [vmem:[%s1697_s24 + $0x78] sm:$0xff] %v1396_v42  }
 0x11f   : > { %1403 = vst [vmem:[%s1697_s24 + $0x30] sm:$0xff] %v1351_v43   ;;  %1411 = vst [vmem:[%s1697_s24 + $0x70] sm:$0xff] %v1391_v44  }
 0x120 PF: > { %s14_s17 = sadd.s32 1, %s1571_s17   ;;  %s1777_s15 = smov %s1567_s16 }
 0x121   : > { %p11_p5 = scmp.ge.s32.totalorder %s14_s17, 4   ;;  %s1778_s16 = smov %s1780_s18 }
 0x123   :  { %13 = sbr.rel (!%p11_p5) target bundleno = 2 (0x2), region = 83 }

</bundles_post_ra>
